<compile_context>
chip_gen: v6e
topology: v6e:2x2x1
jax: 0.10.0
libtpu: 0.0.40
codegen_flags: <defaults>
</compile_context>

<pallas_src>
import functools

import jax
import jax.numpy as jnp
from jax.experimental import pallas as pl
from jax.experimental.pallas import tpu as pltpu


def _round_up(x, m):
    return ((x + m - 1) // m) * m


# ----------------------------- Pallas kernel ------------------------------ #

def _gate_kernel(xp_ref, xr_ref, wp_ref, wr_ref, b_ref, h_ref, gw_ref,
                 *, d, pct_per_gate):
    # y = [ xp@wn , xr@wr , xp@wcp + xr@wcr ] + [bn | br | 0]   -> (tb, 3d)
    y = (jnp.dot(xp_ref[...], wp_ref[...], preferred_element_type=jnp.float32)
         + jnp.dot(xr_ref[...], wr_ref[...], preferred_element_type=jnp.float32)
         + b_ref[...])

    # Single merged tanh over both branch pre-activations.
    t = jnp.tanh(y[:, :2 * d])
    h_plot = t[:, :d]                      # tanh(narrative_w(x_plot))
    h_rb = t[:, d:]                        # tanh(review_w(x_rb))
    z = jax.nn.sigmoid(y[:, 2 * d:])       # sigmoid(control_gate(cat(xp, xr)))

    # Gated combination.
    h = z * h_plot + (1.0 - z) * h_rb
    h_ref[...] = h.astype(h_ref.dtype)

    # Gate statistics: % of gates > 0.5 attributed to each branch (divide-free;
    # exact for D a power of two).
    count = jnp.sum((z > 0.5).astype(jnp.float32), axis=-1, keepdims=True)  # (tb,1)
    plot_pct = count * pct_per_gate        # == count / D * 100
    rb_pct = 100.0 - plot_pct              # == (D - count) / D * 100
    gw_ref[:, 0:1] = plot_pct.astype(gw_ref.dtype)
    gw_ref[:, 1:2] = rb_pct.astype(gw_ref.dtype)


# ---------------------------- Jitted gate path ----------------------------- #

@functools.partial(jax.jit, static_argnames=("d",))
def _gate_forward(x_plot, x_rb, w_top, w_bot, b_fused, *, d):
    b = x_plot.shape[0]

    # Batch tile: full batch for small/medium B (block == full array dim is
    # always a legal block shape); for large B pick a big, sublane-aligned tile
    # but keep >=2 grid steps so v7x can shard across its two TensorCores.
    if b <= 1024:
        tb = b
    else:
        tb = min(4096, _round_up(pl.cdiv(b, 2), 8))
    grid = (pl.cdiv(b, tb),)

    kernel = functools.partial(_gate_kernel, d=d, pct_per_gate=100.0 / float(d))

    cost = pl.CostEstimate(
        flops=2 * b * (2 * d) * (3 * d),
        transcendentals=3 * b * d,
        bytes_accessed=4 * (2 * b * d            # x_plot + x_rb
                            + 2 * d * 3 * d      # split fused weights
                            + 3 * d              # fused bias
                            + b * d              # h out
                            + b * 2),            # gate stats out
    )

    h, gw = pl.pallas_call(
        kernel,
        out_shape=(
            jax.ShapeDtypeStruct((b, d), jnp.float32),   # h
            jax.ShapeDtypeStruct((b, 2), jnp.float32),   # gate stats
        ),
        grid=grid,
        in_specs=[
            pl.BlockSpec((tb, d), lambda i: (i, 0)),          # x_plot
            pl.BlockSpec((tb, d), lambda i: (i, 0)),          # x_rb
            pl.BlockSpec((d, 3 * d), lambda i: (0, 0)),       # W_top (resident)
            pl.BlockSpec((d, 3 * d), lambda i: (0, 0)),       # W_bot (resident)
            pl.BlockSpec((1, 3 * d), lambda i: (0, 0)),       # fused bias
        ],
        out_specs=(
            pl.BlockSpec((tb, d), lambda i: (i, 0)),          # h
            pl.BlockSpec((tb, 2), lambda i: (i, 0)),          # gate stats
        ),
        compiler_params=pltpu.CompilerParams(
            dimension_semantics=("parallel",)),
        cost_estimate=cost,
    )(x_plot, x_rb, w_top, w_bot, b_fused)

    return gw, h


# ------------------------------- Wrapper ----------------------------------- #

class RepresentationCombiner:
    """JAX/Pallas port of the PyTorch RepresentationCombiner."""

    def __init__(self, combine_method, incoming_data_size=32, key=None):
        self.combine_method = combine_method
        self.incoming_data_size = float(incoming_data_size)
        self.d = int(incoming_data_size)
        if combine_method == 'gate':
            if key is None:
                key = jax.random.PRNGKey(0)
            kn, kbn, kr, kbr, kc = jax.random.split(key, 5)
            d = self.d
            bound = 1.0 / jnp.sqrt(d)
            # PyTorch Linear stores weight as (out, in); keep transposed (in, out).
            self.wn_t = jax.random.uniform(kn, (d, d), jnp.float32, -bound, bound)
            self.bn = jax.random.uniform(kbn, (1, d), jnp.float32, -bound, bound)
            self.wr_t = jax.random.uniform(kr, (d, d), jnp.float32, -bound, bound)
            self.br = jax.random.uniform(kbr, (1, d), jnp.float32, -bound, bound)
            bound_c = 1.0 / jnp.sqrt(2 * d)
            wc = jax.random.uniform(kc, (d, 2 * d), jnp.float32, -bound_c, bound_c)
            self.wcp_t = wc[:, :d].T     # control_gate, plot half (transposed)
            self.wcr_t = wc[:, d:].T     # control_gate, review half (transposed)

            # Fused weight, stored pre-split into its two row blocks:
            #   W_top = [ wn , 0  , wcp ]   (d, 3d)   multiplied by x_plot
            #   W_bot = [ 0  , wr , wcr ]   (d, 3d)   multiplied by x_rb
            zeros_dd = jnp.zeros((d, d), jnp.float32)
            self.w_top = jnp.concatenate([self.wn_t, zeros_dd, self.wcp_t], axis=-1)
            self.w_bot = jnp.concatenate([zeros_dd, self.wr_t, self.wcr_t], axis=-1)
            self.b_fused = jnp.concatenate(
                [self.bn, self.br, jnp.zeros((1, d), jnp.float32)], axis=-1)

    def __call__(self, representation_list):
        if self.combine_method == 'simple_concat':
            # Glue only: no hot-path compute, stays in plain JAX.
            b = representation_list[0].shape[0]
            null_gate_weights = jnp.zeros((b, 2), jnp.float32)
            return null_gate_weights, jnp.concatenate(representation_list, axis=-1)

        elif self.combine_method == 'gate':
            x_plot = representation_list[0]
            x_rb = representation_list[-1]
            assert x_plot.shape[-1] == self.d
            return _gate_forward(x_plot, x_rb, self.w_top, self.w_bot,
                                 self.b_fused, d=self.d)


# ------------------------------ Reference ---------------------------------- #

def _gate_reference(mod, reps):
    x_plot, x_rb = reps[0], reps[-1]
    h_plot = jnp.tanh(x_plot @ mod.wn_t + mod.bn)
    h_rb = jnp.tanh(x_rb @ mod.wr_t + mod.br)
    z = jax.nn.sigmoid(x_plot @ mod.wcp_t + x_rb @ mod.wcr_t)
    h = z * h_plot + (1.0 - z) * h_rb
    count = jnp.sum((z > 0.5).astype(jnp.float32), axis=-1)
    gw = jnp.stack([count / mod.incoming_data_size * 100.0,
                    (mod.incoming_data_size - count) / mod.incoming_data_size * 100.0],
                   axis=1)
    return gw, h


# -------------------------------- Main ------------------------------------- #

if __name__ == "__main__":
    key = jax.random.PRNGKey(0)
    k_param, k_plot, k_rb = jax.random.split(key, 3)

    B, D = 2, 32
    x_plot = jax.random.normal(k_plot, (B, D), jnp.float32)
    x_rb = jax.random.normal(k_rb, (B, D), jnp.float32)
    representation_list = [x_plot, x_rb]

    combiner = RepresentationCombiner('gate', incoming_data_size=D, key=k_param)
    gate_weights, h = combiner(representation_list)
    jax.block_until_ready((gate_weights, h))

    # quick correctness check vs pure-JAX reference
    gw_ref, h_ref = _gate_reference(combiner, representation_list)
    assert h.shape == (B, D) and gate_weights.shape == (B, 2)
    assert jnp.allclose(h, h_ref, atol=1e-5), "h mismatch"
    assert jnp.allclose(gate_weights, gw_ref, atol=1e-5), "gate_weights mismatch"

    # also exercise the simple_concat path (plain JAX glue)
    combiner_sc = RepresentationCombiner('simple_concat', incoming_data_size=D)
    null_gw, cat = combiner_sc(representation_list)
    jax.block_until_ready((null_gw, cat))
    assert cat.shape == (B, 2 * D) and null_gw.shape == (B, 2)

    print("KERNEL_OK")
</pallas_src>

<mosaic_0001>
module attributes {stable_mosaic.version = 11 : i64} {
  func.func @_gate_kernel(%arg0: i32, %arg1: memref<2x32xf32, #tpu.memory_space<vmem>>, %arg2: memref<2x32xf32, #tpu.memory_space<vmem>>, %arg3: memref<32x96xf32, #tpu.memory_space<vmem>>, %arg4: memref<32x96xf32, #tpu.memory_space<vmem>>, %arg5: memref<1x96xf32, #tpu.memory_space<vmem>>, %arg6: memref<2x32xf32, #tpu.memory_space<vmem>>, %arg7: memref<2x2xf32, #tpu.memory_space<vmem>>) attributes {dimension_semantics = [#tpu.dimension_semantics<parallel>], iteration_bounds = array<i64: 1>, scalar_prefetch = 0 : i64, scratch_operands = 0 : i64, tpu.core_type = #tpu.core_type<tc>, window_params = [{transform_indices = @transform_0, window_bounds = array<i64: 2, 32>}, {transform_indices = @transform_1, window_bounds = array<i64: 2, 32>}, {pipeline_mode = #tpu.pipeline_mode<synchronous>, transform_indices = @transform_2, window_bounds = array<i64: 32, 96>}, {pipeline_mode = #tpu.pipeline_mode<synchronous>, transform_indices = @transform_3, window_bounds = array<i64: 32, 96>}, {pipeline_mode = #tpu.pipeline_mode<synchronous>, transform_indices = @transform_4, window_bounds = array<i64: 1, 96>}, {transform_indices = @transform_5, window_bounds = array<i64: 2, 32>}, {transform_indices = @transform_6, window_bounds = array<i64: 2, 2>}]} {
    %c0 = arith.constant 0 : index
    %c0_0 = arith.constant 0 : index
    %0 = vector.load %arg1[%c0, %c0_0] : memref<2x32xf32, #tpu.memory_space<vmem>>, vector<2x32xf32>
    %c0_1 = arith.constant 0 : index
    %c0_2 = arith.constant 0 : index
    %1 = vector.load %arg3[%c0_1, %c0_2] : memref<32x96xf32, #tpu.memory_space<vmem>>, vector<32x96xf32>
    %cst = arith.constant dense<0.000000e+00> : vector<2x96xf32>
    %2 = tpu.matmul %0, %1, %cst {dimension_numbers = #tpu.dot_dimension_numbers<[1], [0], [0], [1], [0, 0, 1, 1], [], []>} : vector<2x32xf32>, vector<32x96xf32>, vector<2x96xf32> -> vector<2x96xf32>
    %c0_3 = arith.constant 0 : index
    %c0_4 = arith.constant 0 : index
    %3 = vector.load %arg2[%c0_3, %c0_4] : memref<2x32xf32, #tpu.memory_space<vmem>>, vector<2x32xf32>
    %c0_5 = arith.constant 0 : index
    %c0_6 = arith.constant 0 : index
    %4 = vector.load %arg4[%c0_5, %c0_6] : memref<32x96xf32, #tpu.memory_space<vmem>>, vector<32x96xf32>
    %cst_7 = arith.constant dense<0.000000e+00> : vector<2x96xf32>
    %5 = tpu.matmul %3, %4, %cst_7 {dimension_numbers = #tpu.dot_dimension_numbers<[1], [0], [0], [1], [0, 0, 1, 1], [], []>} : vector<2x32xf32>, vector<32x96xf32>, vector<2x96xf32> -> vector<2x96xf32>
    %6 = arith.addf %2, %5 : vector<2x96xf32>
    %c0_8 = arith.constant 0 : index
    %c0_9 = arith.constant 0 : index
    %7 = vector.load %arg5[%c0_8, %c0_9] : memref<1x96xf32, #tpu.memory_space<vmem>>, vector<1x96xf32>
    %8 = vector.broadcast %7 : vector<1x96xf32> to vector<2x96xf32>
    %9 = arith.addf %6, %8 : vector<2x96xf32>
    %10 = vector.extract_strided_slice %9 {offsets = [0, 0], sizes = [2, 64], strides = [1, 1]} : vector<2x96xf32> to vector<2x64xf32>
    %11 = math.tanh %10 : vector<2x64xf32>
    %12 = vector.extract_strided_slice %11 {offsets = [0, 0], sizes = [2, 32], strides = [1, 1]} : vector<2x64xf32> to vector<2x32xf32>
    %13 = vector.extract_strided_slice %11 {offsets = [0, 32], sizes = [2, 32], strides = [1, 1]} : vector<2x64xf32> to vector<2x32xf32>
    %14 = vector.extract_strided_slice %9 {offsets = [0, 64], sizes = [2, 32], strides = [1, 1]} : vector<2x96xf32> to vector<2x32xf32>
    %15 = arith.negf %14 : vector<2x32xf32>
    %16 = math.exp %15 : vector<2x32xf32>
    %cst_10 = arith.constant 1.000000e+00 : f32
    %17 = vector.broadcast %cst_10 : f32 to vector<2x32xf32>
    %18 = arith.addf %17, %16 : vector<2x32xf32>
    %19 = arith.divf %17, %18 : vector<2x32xf32>
    %20 = arith.mulf %19, %12 : vector<2x32xf32>
    %cst_11 = arith.constant 1.000000e+00 : f32
    %21 = vector.broadcast %cst_11 : f32 to vector<2x32xf32>
    %22 = arith.subf %21, %19 : vector<2x32xf32>
    %23 = arith.mulf %22, %13 : vector<2x32xf32>
    %24 = arith.addf %20, %23 : vector<2x32xf32>
    %c0_12 = arith.constant 0 : index
    %c0_13 = arith.constant 0 : index
    %25 = vector.load %arg6[%c0_12, %c0_13] : memref<2x32xf32, #tpu.memory_space<vmem>>, vector<2x32xf32>
    tpu.vector_store %arg6[%c0_12, %c0_13], %24 {strides = array<i32>} : memref<2x32xf32, #tpu.memory_space<vmem>>, vector<2x32xf32>,
    %cst_14 = arith.constant 5.000000e-01 : f32
    %26 = vector.broadcast %cst_14 : f32 to vector<2x32xf32>
    %27 = arith.cmpf ogt, %19, %26 : vector<2x32xf32>
    %28 = arith.extui %27 : vector<2x32xi1> to vector<2x32xi32>
    %29 = arith.sitofp %28 : vector<2x32xi32> to vector<2x32xf32>
    %cst_15 = arith.constant dense<0.000000e+00> : vector<2xf32>
    %30 = vector.multi_reduction <add>, %29, %cst_15 [1] : vector<2x32xf32> to vector<2xf32>
    %31 = vector.shape_cast %30 : vector<2xf32> to vector<2x1xf32>
    %cst_16 = arith.constant 3.125000e+00 : f32
    %32 = vector.broadcast %cst_16 : f32 to vector<2x1xf32>
    %33 = arith.mulf %31, %32 : vector<2x1xf32>
    %cst_17 = arith.constant 1.000000e+02 : f32
    %34 = vector.broadcast %cst_17 : f32 to vector<2x1xf32>
    %35 = arith.subf %34, %33 : vector<2x1xf32>
    %c0_18 = arith.constant 0 : index
    %c0_19 = arith.constant 0 : index
    %36 = vector.load %arg7[%c0_18, %c0_19] : memref<2x2xf32, #tpu.memory_space<vmem>>, vector<2x1xf32>
    tpu.vector_store %arg7[%c0_18, %c0_19], %33 {strides = array<i32>} : memref<2x2xf32, #tpu.memory_space<vmem>>, vector<2x1xf32>,
    %c0_20 = arith.constant 0 : index
    %c1 = arith.constant 1 : index
    %37 = vector.load %arg7[%c0_20, %c1] : memref<2x2xf32, #tpu.memory_space<vmem>>, vector<2x1xf32>
    tpu.vector_store %arg7[%c0_20, %c1], %35 {strides = array<i32>} : memref<2x2xf32, #tpu.memory_space<vmem>>, vector<2x1xf32>,
    return
  }
  func.func @transform_0(%arg0: i32) -> (i32, i32) {
    %c0_i32 = arith.constant 0 : i32
    %c0_i32_0 = arith.constant 0 : i32
    return %arg0, %c0_i32 : i32, i32
  }
  func.func @transform_1(%arg0: i32) -> (i32, i32) {
    %c0_i32 = arith.constant 0 : i32
    %c0_i32_0 = arith.constant 0 : i32
    return %arg0, %c0_i32 : i32, i32
  }
  func.func @transform_2(%arg0: i32) -> (i32, i32) {
    %c0_i32 = arith.constant 0 : i32
    %c0_i32_0 = arith.constant 0 : i32
    %c0_i32_1 = arith.constant 0 : i32
    return %c0_i32, %c0_i32_0 : i32, i32
  }
  func.func @transform_3(%arg0: i32) -> (i32, i32) {
    %c0_i32 = arith.constant 0 : i32
    %c0_i32_0 = arith.constant 0 : i32
    %c0_i32_1 = arith.constant 0 : i32
    return %c0_i32, %c0_i32_0 : i32, i32
  }
  func.func @transform_4(%arg0: i32) -> (i32, i32) {
    %c0_i32 = arith.constant 0 : i32
    %c0_i32_0 = arith.constant 0 : i32
    %c0_i32_1 = arith.constant 0 : i32
    return %c0_i32, %c0_i32_0 : i32, i32
  }
  func.func @transform_5(%arg0: i32) -> (i32, i32) {
    %c0_i32 = arith.constant 0 : i32
    %c0_i32_0 = arith.constant 0 : i32
    return %arg0, %c0_i32 : i32, i32
  }
  func.func @transform_6(%arg0: i32) -> (i32, i32) {
    %c0_i32 = arith.constant 0 : i32
    %c0_i32_0 = arith.constant 0 : i32
    return %arg0, %c0_i32 : i32, i32
  }
}

</mosaic_0001>

<bundles_post_ra>
// kernel: _gate_forward.1
= control target key start
LH: loop header
LB: loop body
LE: loop exit
PB: predicated region body
PF: predicated region fallthrough
CT: control target
= control target key end

     0   :  { %12 = vsyncpa [#allocation3], 0  ;;  %s564_s0 = inlined_call_operand.hbm [shape: f32[2,32], index: 0, kind: input, shape index: {}]   ;;  %s565_s1 = inlined_call_operand.hbm [shape: f32[2,32], index: 1, kind: input, shape index: {}]   ;;  %s566_s2 = inlined_call_operand.hbm [shape: f32[32,96], index: 2, kind: input, shape index: {}]   ;;  %s567_s3 = inlined_call_operand.hbm [shape: f32[32,96], index: 3, kind: input, shape index: {}]   ;;  %s568_s4 = inlined_call_operand.vmem [shape: f32[1,96], index: 4, kind: input, shape index: {}]   ;;  %s569_s5 = inlined_call_operand.hbm [shape: f32[2,32], index: 5, kind: output, shape index: {0}]   ;;  %s570_s6 = inlined_call_operand.hbm [shape: f32[2,2], index: 6, kind: output, shape index: {1}]  }
   0x1   :  { %13 = vsyncpa [#allocation6], 0 }
   0x2   :  { %14 = vsyncpa [#allocation9], 0 }
   0x3   :  { %15 = vsyncpa [#allocation4], 0 }
   0x4   :  { %16 = vsyncpa [#allocation12], 0  ;;  %s496_s21 = smov [#allocation5]   ;;  %s497_s23 = smov [#allocation2]  }
   0x5   :  { %s33_s22 = sshll.u32 %s496_s21, 4  ;;  %s23_s24 = sshll.u32 %s497_s23, 4  ;;  %s34_s22 = int_to_ptr.vmem [resolvable:$true] %s33_s22  ;;  %s24_s24 = int_to_ptr.vmem [resolvable:$true] %s23_s24 }
   0x6   :  { %s374_s25 = scalar_lea.vmem %s34_s22, 32  ;;  %p379_p1 = scmp.lt.s32.totalorder %s34_s22, %s34_s22 }
   0x7   :  { %p375_p0 = scmp.ne.s32.totalorder %s34_s22, %s374_s25  ;;  %p380_p2 = scmp.lt.s32.totalorder %s374_s25, %s374_s25 }
   0x9   :  { %p381_p3 = por %p380_p2, %p379_p1 }
   0xb   :  { %p382_p4 = pnand %p381_p3, %p375_p0 }
   0xd   :  { %385 = shalt.err (!%p382_p4)
}
   0xe   :  { %36 = dma.hbm_to_vmem [thread:$0]  %s565_s1, 32, %s34_s22, [#allocation6]  }
   0xf   :  { %s394_s28 = scalar_lea.vmem %s24_s24, 32  ;;  %p399_p6 = scmp.lt.s32.totalorder %s24_s24, %s24_s24 }
  0x10   :  { %p395_p5 = scmp.ne.s32.totalorder %s24_s24, %s394_s28  ;;  %p400_p7 = scmp.lt.s32.totalorder %s394_s28, %s394_s28 }
  0x12   :  { %p401_p8 = por %p400_p7, %p399_p6 }
  0x14   :  { %p402_p9 = pnand %p401_p8, %p395_p5 }
  0x16   :  { %405 = shalt.err (!%p402_p9)
}
  0x17   :  { %26 = dma.hbm_to_vmem [thread:$0]  %s564_s0, 32, %s24_s24, [#allocation3]  }
  0x18   :  { %s498_s7 = smov [#allocation7]  }
  0x19   :  { %s42_s8 = sshll.u32 %s498_s7, 4  ;;  %s43_s8 = int_to_ptr.vmem [resolvable:$true] %s42_s8 }
  0x1a   :  { %s414_s9 = scalar_lea.vmem %s43_s8, 512  ;;  %p419_p11 = scmp.lt.s32.totalorder %s43_s8, %s43_s8 }
  0x1b   :  { %p415_p10 = scmp.ne.s32.totalorder %s43_s8, %s414_s9  ;;  %p420_p12 = scmp.lt.s32.totalorder %s414_s9, %s414_s9 }
  0x1d   :  { %p421_p13 = por %p420_p12, %p419_p11 }
  0x1f   :  { %p422_p0 = pnand %p421_p13, %p415_p10 }
  0x21   :  { %425 = shalt.err (!%p422_p0)
}
  0x22   :  { %s499_s1 = smov 128   ;;  %s500_s10 = smov 8  }
  0x23   :  { %48 = dma.hbm_to_vmem [thread:$0]  %s566_s2, 512, %s43_s8, [#allocation6], %s499_s1, %s499_s1, %s500_s10  }
  0x24   :  { %s501_s13 = smov [#allocation8]  }
  0x25   :  { %s54_s14 = sshll.u32 %s501_s13, 4  ;;  %s55_s14 = int_to_ptr.vmem [resolvable:$true] %s54_s14 }
  0x26   :  { %s434_s0 = scalar_lea.vmem %s55_s14, 512  ;;  %p439_p2 = scmp.lt.s32.totalorder %s55_s14, %s55_s14 }
  0x27   :  { %p435_p1 = scmp.ne.s32.totalorder %s55_s14, %s434_s0  ;;  %p440_p3 = scmp.lt.s32.totalorder %s434_s0, %s434_s0 }
  0x29   :  { %p441_p4 = por %p440_p3, %p439_p2 }
  0x2b   :  { %p442_p5 = pnand %p441_p4, %p435_p1 }
  0x2d   :  { %445 = shalt.err (!%p442_p5)
}
  0x2e   :  { %60 = dma.hbm_to_vmem [thread:$0]  %s567_s3, 512, %s55_s14, [#allocation9], %s499_s1, %s499_s1, %s500_s10  }
  0x2f   :  { %486 = dma.done.wait [#allocation3], 32  }
  0x30   :  { %487 = vsyncadd [#allocation3], 4294967264 }
  0x31   :  { %488 = dma.done.wait [#allocation6], 544  }
  0x32   :  { %489 = vsyncadd [#allocation6], 4294966752 }
  0x33   :  { %490 = dma.done.wait [#allocation9], 512  }
  0x34   :  { %491 = vsyncadd [#allocation9], 4294966784  ;;  %v502_v0 = vmov 0.0   ;;  %vm503_vm0 = vmmov 0   ;;  %v84_v1 = vld [vmem:[#allocation8 + $0x18] sm:$0xff]  ;;  %v83_v3 = vld [vmem:[#allocation8 + $0x10] sm:$0xff] }
  0x35   :  { %326 = vmatprep.subr.mxu0 %v502_v0  ;;  %337 = vmatprep.subr.mxu1 %v502_v0  ;;  %v79_v2 = vld [vmem:[#allocation7 + $0x18] sm:$0xff]  ;;  %v78_v4 = vld [vmem:[#allocation7 + $0x10] sm:$0xff]  ;;  %v82_v5 = vld [vmem:[#allocation8 + $0x8] sm:$0xff]  ;;  %vm85_vm1 = vcmask 261120   ;;  %s504_s17 = smov 32   ;;  %s505_s18 = smov 64  }
  0x36   :  { %334 = vmatprep.mubr.msk.f32.mxu0 %vm503_vm0, %v502_v0  ;;  %345 = vmatprep.mubr.msk.f32.mxu1 %vm503_vm0, %v502_v0  ;;  %v77_v6 = vld [vmem:[#allocation7 + $0x8] sm:$0xff]  ;;  %v81_v7 = vld [vmem:[#allocation8] sm:$0xff]  ;;  %v80_v9 = vld [vmem:[#allocation5] sm:$0x3]  ;;  %vm262_vm3 = vcmask 254976  }
  0x37   :  { %327 = vmatpush3.msra.mxu0 %v84_v1  ;;  %338 = vmatpush3.msra.mxu1 %v79_v2  ;;  %v76_v8 = vld [vmem:[#allocation7] sm:$0xff]  ;;  %v75_v10 = vld [vmem:[#allocation2] sm:$0x3] }
  0x38   :  { %328 = vmatprep.subr.mxu0 %v502_v0  ;;  %339 = vmatprep.subr.mxu1 %v502_v0  ;;  %v313_v13 = vld [vmem:[%s568_s4] ss:$0 sm:$0xff]  ;;  %s506_s4 = smov [#allocation10]  }
  0x39   :  { %329 = vmatpush3.msra.mxu0 %v83_v3  ;;  %340 = vmatpush3.msra.mxu1 %v78_v4  ;;  %s286_s19 = sshll.u32 %s506_s4, 4  ;;  %s287_s19 = int_to_ptr.vmem [resolvable:$true] %s286_s19 }
  0x3a   :  { %330 = vmatprep.subr.mxu0 %v502_v0  ;;  %341 = vmatprep.subr.mxu1 %v502_v0  ;;  %s446_s20 = scalar_lea.vmem %s287_s19, 32  ;;  %p451_p7 = scmp.lt.s32.totalorder %s287_s19, %s287_s19 }
  0x3b   :  { %331 = vmatpush3.msra.mxu0 %v82_v5  ;;  %342 = vmatpush3.msra.mxu1 %v77_v6  ;;  %p447_p6 = scmp.ne.s32.totalorder %s287_s19, %s446_s20  ;;  %p452_p8 = scmp.lt.s32.totalorder %s446_s20, %s446_s20 }
  0x3c   :  { %332 = vmatprep.subr.mxu0 %v502_v0  ;;  %343 = vmatprep.subr.mxu1 %v502_v0 }
  0x3d   :  { %333 = vmatpush3.msra.mxu0 %v81_v7  ;;  %344 = vmatpush3.msra.mxu1 %v76_v8  ;;  %p453_p9 = por %p452_p8, %p451_p7 }
  0x3e   :  { %335 = vmatmul.mubr.msk.f32.vlgmr.msra.gmra.mxu0 %vm85_vm1, %v80_v9  ;;  %346 = vmatmul.mubr.msk.f32.vlgmr.msra.gmra.mxu1 %vm85_vm1, %v75_v10 }
  0x3f   :  { %p454_p10 = pnand %p453_p9, %p447_p6 }
  0xfe   :  { %v155_v11 = vpop.f32.mrf.mxu0  ;;  %v228_v12 = vpop.f32.mrf.mxu1 }
  0xff   :  { %v229_v14 = vadd.f32 %v228_v12, %v155_v11 }
 0x100   :  { %v336_v15 = vpop.f32.mrf.mxu0  ;;  %v347_v16 = vpop.f32.mrf.mxu1 }
 0x101   :  { %v239_v17 = vadd.f32 %v313_v13, %v229_v14 }
 0x103   :  { %360 = vtanh.f32 %v239_v17  ;;  %v314_v18 = vmul.f32 -1.442695, %v239_v17 }
 0x105   :  { %362 = vpow2.f32 %v314_v18 }
 0x110   :  { %v361_v19 = vpop.eup %360 }
 0x111   :  { %253 = vrot.lane.b32.xlu1 %v361_v19, %s504_s17 }
 0x112   :  { %v363_v20 = vpop.eup %362 }
 0x113   :  { %v244_v21 = vadd.f32 1.0, %v363_v20 }
 0x115   :  { %364 = vrcp.f32 %v244_v21 }
 0x122   :  { %v365_v22 = vpop.eup %364 }
 0x123   :  { %vm264_vm2 = vcmp.gt.f32.partialorder %v365_v22, 0.5  ;;  %v252_v27 = vsub.f32 1.0, %v365_v22 }
 0x124   :  { %v315_v23 = vsel %vm264_vm2, 1.0, %v502_v0 }
 0x125   :  { %268 = vrot.lane.b32.xlu0 %v315_v23, %s505_s18 }
 0x129   :  { %248 = vrot.lane.b32.xlu0 %v361_v19, %s505_s18 }
 0x183   :  { %v254_v26 = vpop.permute.xlu1 %253 }
 0x184   :  { %v256_v29 = vmul.f32 %v254_v26, %v252_v27 }
 0x197   :  { %v269_v24 = vpop.permute.xlu0 %268 }
 0x198   :  { %v271_v25 = vsel %vm262_vm3, %v269_v24, 0.0 }
 0x199   :  { %272 = vadd.xlane.f32.xlu1 %v271_v25 }
 0x19b   :  { %v249_v28 = vpop.permute.xlu0 %248 }
 0x19c   :  { %v251_v30 = vmul.f32 %v365_v22, %v249_v28 }
 0x19e   :  { %v257_v31 = vadd.f32 %v256_v29, %v251_v30 }
 0x1a0   :  { %259 = vrot.lane.b32.xlu0 %v257_v31, %s505_s18 }
 0x212   :  { %v260_v32 = vpop.permute.xlu0 %259 }
 0x213   :  { %263 = vst.msk [vmem:[#allocation10] sm:$0x3] %vm262_vm3, %v260_v32 }
 0x214   :  { %457 = shalt.err (!%p454_p10)
}
 0x215   :  { %289 = dma.vmem_to_hbm [thread:$0]  %s287_s19, 32, %s569_s5, [#allocation4]   ;;  %vm276_vm4 = vcmask 1024   ;;  %vm278_vm5 = vcmask 9224  }
 0x216   :  { %s507_s23 = smov [#allocation11]  }
 0x217   :  { %s296_s24 = sshll.u32 %s507_s23, 4  ;;  %s297_s24 = int_to_ptr.vmem [resolvable:$true] %s296_s24 }
 0x218   :  { %s466_s25 = scalar_lea.vmem %s297_s24, 32  ;;  %p471_p12 = scmp.lt.s32.totalorder %s297_s24, %s297_s24 }
 0x219   :  { %p467_p11 = scmp.ne.s32.totalorder %s297_s24, %s466_s25  ;;  %p472_p13 = scmp.lt.s32.totalorder %s466_s25, %s466_s25 }
 0x21b   :  { %p473_p0 = por %p472_p13, %p471_p12 }
 0x21d   :  { %p474_p1 = pnand %p473_p0, %p467_p11 }
 0x222   :  { %v273_v33 = vpop.xlane.xlu1 %272 }
 0x223   :  { %v274_v34 = vmul.f32 3.125, %v273_v33 }
 0x225   :  { %v275_v35 = vsub.f32 100.0, %v274_v34  ;;  %277 = vst.msk [vmem:[#allocation11] sm:$0x3] %vm276_vm4, %v274_v34 }
 0x227   :  { %279 = vst.msk [vmem:[#allocation11] sm:$0x3] %vm278_vm5, %v275_v35 }
 0x228   :  { %477 = shalt.err (!%p474_p1)
}
 0x229   :  { %299 = dma.vmem_to_hbm [thread:$0]  %s297_s24, 32, %s570_s6, [#allocation12]  }
 0x22a   :  { %492 = dma.done.wait [#allocation4], 32  }
 0x22b   :  { %493 = vsyncadd [#allocation4], 4294967264 }
 0x22c   :  { %494 = dma.done.wait [#allocation12], 32  }
 0x22d   :  { %495 = vsyncadd [#allocation12], 4294967264 }
 0x22e   :  { %306 = vsyncpa [#allocation3], 1 }
 0x22f   :  { %307 = vsyncpa [#allocation6], 1 }
 0x230   :  { %308 = vsyncpa [#allocation9], 1 }
 0x231   :  { %309 = vsyncpa [#allocation4], 1 }
 0x232   :  { %310 = vsyncpa [#allocation12], 1 }

</bundles_post_ra>
